<compile_context>
chip_gen: v7x
topology: tpu7x:2x2x1
jax: 0.10.0
libtpu: 0.0.40
codegen_flags: <defaults>
</compile_context>

<pallas_src>
import jax
import jax.numpy as jnp
from jax import lax
from jax.experimental import pallas as pl
from jax.experimental.pallas import tpu as pltpu


def _make_kernel(batched, use_acc, single_k):
    """Build the per-tile kernel body.

    batched : refs carry a leading bb batch dim (tiny-per-batch regime).
    use_acc : accumulate in an f32 VMEM scratch (non-f32 outputs, multi-K).
    single_k: only one K grid step -> write the dot result directly.
    """
    if batched:
        # (bb, tk, tm) x (bb, tk, tn) -> (bb, tm, tn): contract K of BOTH
        # operands, so x1.permute(0, 2, 1) becomes a transposed-LHS MXU feed.
        dims = (((1,), (1,)), ((0,), (0,)))
    else:
        # (tk, tm) x (tk, tn) -> (tm, tn): transposed-LHS contraction.
        dims = (((0,), (0,)), ((), ()))

    def contract(a, b):
        return lax.dot_general(
            a, b, dimension_numbers=dims, preferred_element_type=jnp.float32
        )

    if single_k:

        def kernel(x1_ref, x2_ref, o_ref):
            o_ref[...] = contract(x1_ref[...], x2_ref[...]).astype(o_ref.dtype)

    elif use_acc:

        def kernel(x1_ref, x2_ref, o_ref, acc_ref):
            k = pl.program_id(3)

            @pl.when(k == 0)
            def _():
                acc_ref[...] = jnp.zeros_like(acc_ref)

            acc_ref[...] += contract(x1_ref[...], x2_ref[...])

            @pl.when(k == pl.num_programs(3) - 1)
            def _():
                o_ref[...] = acc_ref[...].astype(o_ref.dtype)

    else:
        # f32 output: accumulate directly in the resident output block (its
        # block index ignores k), no separate scratch and no final copy.
        def kernel(x1_ref, x2_ref, o_ref):
            k = pl.program_id(3)

            @pl.when(k == 0)
            def _():
                o_ref[...] = jnp.zeros_like(o_ref)

            o_ref[...] += contract(x1_ref[...], x2_ref[...])

    return kernel


def _pick_tile(dim, target, align):
    """Largest tile <= target that divides dim and is `align`-aligned.

    Falls back to the full dim (always a legal block shape) when the dim is
    small or has no aligned divisor <= target.
    """
    if dim <= target:
        return dim
    t = (target // align) * align
    while t >= align:
        if dim % t == 0:
            return t
        t -= align
    # TODO(synk): awkward (prime-ish) large dims fall back to a full-dim block;
    # a cdiv grid with a masked edge tile would bound VMEM better on v7x.
    return dim


def _pick_batch_block(batch, per_batch_bytes, budget_bytes=1 << 20):
    """Largest divisor of `batch` whose folded block stays within budget."""
    best = 1
    for bb in range(1, batch + 1):
        if batch % bb == 0 and bb * per_batch_bytes <= budget_bytes:
            best = bb
    return best


def bmm_transposed(x1, x2):
    """out[b] = x1[b].T @ x2[b]  (== torch.bmm(x1.permute(0, 2, 1), x2))."""
    B, K, M = x1.shape
    B2, K2, N = x2.shape
    assert B == B2 and K == K2, "batch / contraction dims must match"

    out_dtype = jnp.result_type(x1.dtype, x2.dtype)
    in_itemsize = jnp.dtype(x1.dtype).itemsize
    out_itemsize = jnp.dtype(out_dtype).itemsize

    # dtype-dependent minimum sublane tile for K (second-minor dim of blocks).
    k_align = {4: 8, 2: 16, 1: 32}.get(in_itemsize, 8)

    # M / N are lane (last) dims of their blocks -> 128-aligned (or full-dim).
    # 512 targets raise arithmetic intensity and halve x1/x2 HBM re-reads vs
    # 256; tk up to 1024 cuts reduction-step overhead and accumulator RMW.
    tm = _pick_tile(M, 512, 128)
    tn = _pick_tile(N, 512, 128)
    tk = _pick_tile(K, 1024, k_align)

    # Fold several batches per grid step ONLY in the tiny-matrix regime where
    # the whole per-batch matmul already fits one tile; otherwise bb == 1 so
    # VMEM is spent on big tiles / deeper pipelining, not redundant blocks.
    bb = 1
    whole_per_batch = tm == M and tn == N and tk == K
    if whole_per_batch and B > 1:
        per_batch_bytes = (K * M + K * N) * in_itemsize + 2 * M * N * max(
            out_itemsize, 4
        )
        bb = _pick_batch_block(B, per_batch_bytes)

    num_k = K // tk
    single_k = num_k == 1
    use_acc = (not single_k) and (out_dtype != jnp.float32)
    batched = bb > 1

    grid = (B // bb, M // tm, N // tn, num_k)

    if batched:
        in_specs = [
            pl.BlockSpec((bb, tk, tm), lambda b, i, j, k: (b, k, i)),
            pl.BlockSpec((bb, tk, tn), lambda b, i, j, k: (b, k, j)),
        ]
        out_specs = pl.BlockSpec((bb, tm, tn), lambda b, i, j, k: (b, i, j))
        acc_shape = (bb, tm, tn)
    else:
        # Squeeze the batch dim: kernel sees plain 2-D tiles and one 2-D dot.
        in_specs = [
            pl.BlockSpec((pl.Squeezed(), tk, tm), lambda b, i, j, k: (b, k, i)),
            pl.BlockSpec((pl.Squeezed(), tk, tn), lambda b, i, j, k: (b, k, j)),
        ]
        out_specs = pl.BlockSpec((pl.Squeezed(), tm, tn), lambda b, i, j, k: (b, i, j))
        acc_shape = (tm, tn)

    scratch_shapes = [pltpu.VMEM(acc_shape, jnp.float32)] if use_acc else []

    kernel = _make_kernel(batched, use_acc, single_k)

    cost = pl.CostEstimate(
        flops=2 * B * M * N * K,
        bytes_accessed=in_itemsize * (B * K * M + B * K * N)
        + out_itemsize * B * M * N,
        transcendentals=0,
    )

    return pl.pallas_call(
        kernel,
        out_shape=jax.ShapeDtypeStruct((B, M, N), out_dtype),
        grid_spec=pltpu.PrefetchScalarGridSpec(
            num_scalar_prefetch=0,
            grid=grid,
            in_specs=in_specs,
            out_specs=out_specs,
            scratch_shapes=scratch_shapes,
        ),
        compiler_params=pltpu.CompilerParams(
            # batch / M / N are independent (megacore-shardable); K is the
            # reduction axis and is last in the grid.
            dimension_semantics=("parallel", "parallel", "parallel", "arbitrary"),
            # Above the 16/32 MiB scoped defaults (v5e/v6e/v7x) so the larger
            # tiles double-buffer, but under v7x's 64 MiB physical VMEM.
            vmem_limit_bytes=48 * 1024 * 1024,
        ),
        cost_estimate=cost,
    )(x1, x2)


if __name__ == "__main__":
    key = jax.random.PRNGKey(0)
    k1, k2, k3, k4 = jax.random.split(key, 4)

    # 1) Small generic-bmm shape (exercises the batch-folded tiny-matrix path).
    B, K, M, N = 2, 8, 16, 32
    x1 = jax.random.normal(k1, (B, K, M), dtype=jnp.float32)
    x2 = jax.random.normal(k2, (B, K, N), dtype=jnp.float32)
    out = jax.block_until_ready(bmm_transposed(x1, x2))
    ref = jnp.einsum("bkm,bkn->bmn", x1, x2)
    assert out.shape == (B, M, N)
    assert jnp.allclose(out, ref, atol=1e-4, rtol=1e-4), "mismatch (batched path)"

    # 2) Exact shape from the original module (exercises the bb=1 squeezed path).
    y1 = jax.random.normal(k3, (1, 2, 2), dtype=jnp.float32)
    y2 = jax.random.normal(k4, (1, 2, 2), dtype=jnp.float32)
    out2 = jax.block_until_ready(bmm_transposed(y1, y2))
    ref2 = jnp.einsum("bkm,bkn->bmn", y1, y2)
    assert out2.shape == (1, 2, 2)
    assert jnp.allclose(out2, ref2, atol=1e-4, rtol=1e-4), "mismatch (squeezed path)"

    print("KERNEL_OK")
</pallas_src>

<mosaic_0001>
module attributes {stable_mosaic.version = 11 : i64} {
  func.func @kernel(%arg0: i32, %arg1: i32, %arg2: i32, %arg3: i32, %arg4: memref<2x8x16xf32, #tpu.memory_space<vmem>>, %arg5: memref<2x8x32xf32, #tpu.memory_space<vmem>>, %arg6: memref<2x16x32xf32, #tpu.memory_space<vmem>>) attributes {dimension_semantics = [#tpu.dimension_semantics<parallel>, #tpu.dimension_semantics<parallel>, #tpu.dimension_semantics<parallel>, #tpu.dimension_semantics<arbitrary>], iteration_bounds = array<i64: 1, 1, 1, 1>, scalar_prefetch = 0 : i64, scratch_operands = 0 : i64, tpu.core_type = #tpu.core_type<tc>, window_params = [{transform_indices = @transform_0, window_bounds = array<i64: 2, 8, 16>}, {transform_indices = @transform_1, window_bounds = array<i64: 2, 8, 32>}, {transform_indices = @transform_2, window_bounds = array<i64: 2, 16, 32>}]} {
    %c0 = arith.constant 0 : index
    %c0_0 = arith.constant 0 : index
    %c0_1 = arith.constant 0 : index
    %0 = vector.load %arg4[%c0, %c0_0, %c0_1] : memref<2x8x16xf32, #tpu.memory_space<vmem>>, vector<2x8x16xf32>
    %c0_2 = arith.constant 0 : index
    %c0_3 = arith.constant 0 : index
    %c0_4 = arith.constant 0 : index
    %1 = vector.load %arg5[%c0_2, %c0_3, %c0_4] : memref<2x8x32xf32, #tpu.memory_space<vmem>>, vector<2x8x32xf32>
    %cst = arith.constant dense<0.000000e+00> : vector<2x16x32xf32>
    %2 = tpu.matmul %0, %1, %cst {dimension_numbers = #tpu.dot_dimension_numbers<[1], [1], [2], [2], [0, 0, 0, 2, 1, 2], [0], [0]>} : vector<2x8x16xf32>, vector<2x8x32xf32>, vector<2x16x32xf32> -> vector<2x16x32xf32>
    %c0_5 = arith.constant 0 : index
    %c0_6 = arith.constant 0 : index
    %c0_7 = arith.constant 0 : index
    %3 = vector.load %arg6[%c0_5, %c0_6, %c0_7] : memref<2x16x32xf32, #tpu.memory_space<vmem>>, vector<2x16x32xf32>
    tpu.vector_store %arg6[%c0_5, %c0_6, %c0_7], %2 {strides = array<i32>} : memref<2x16x32xf32, #tpu.memory_space<vmem>>, vector<2x16x32xf32>,
    return
  }
  func.func @transform_0(%arg0: i32, %arg1: i32, %arg2: i32, %arg3: i32) -> (i32, i32, i32) {
    %c0_i32 = arith.constant 0 : i32
    return %arg0, %arg3, %arg1 : i32, i32, i32
  }
  func.func @transform_1(%arg0: i32, %arg1: i32, %arg2: i32, %arg3: i32) -> (i32, i32, i32) {
    %c0_i32 = arith.constant 0 : i32
    return %arg0, %arg3, %arg2 : i32, i32, i32
  }
  func.func @transform_2(%arg0: i32, %arg1: i32, %arg2: i32, %arg3: i32) -> (i32, i32, i32) {
    %c0_i32 = arith.constant 0 : i32
    return %arg0, %arg1, %arg2 : i32, i32, i32
  }
}

</mosaic_0001>

<bundles_post_ra>
// kernel: tpu_custom_call.1
= control target key start
LH: loop header
LB: loop body
LE: loop exit
PB: predicated region body
PF: predicated region fallthrough
CT: control target
= control target key end

     0   :  { %7 = vsyncpa [#allocation3], 0  ;;  %s457_s0 = inlined_call_operand.hbm [shape: f32[2,8,16], index: 0, kind: input, shape index: {}]   ;;  %s458_s1 = inlined_call_operand.hbm [shape: f32[2,8,32], index: 1, kind: input, shape index: {}]   ;;  %s459_s2 = inlined_call_operand.hbm [shape: f32[2,16,32], index: 2, kind: output, shape index: {}]  }
   0x1   :  { %8 = vsyncpa [#allocation6], 0 }
   0x2   :  { %9 = vsyncpa [#allocation4], 0  ;;  %s392_s9 = smov [#allocation2]   ;;  %s320_s13 = scalar_lea.hbm %s457_s0, 256 }
   0x3   :  { %s15_s10 = sshll.u32 %s392_s9, 4  ;;  %p321_p0 = scmp.ne.s32.totalorder %s457_s0, %s320_s13  ;;  %s16_s10 = int_to_ptr.vmem [resolvable:$true] %s15_s10 }
   0x4   :  { %p324_p1 = scmp.lt.u32.totalorder %s320_s13, %s457_s0 }
   0x6   :  { %p326_p2 = pnand %p324_p1, %p321_p0 }
   0x8   :  { %329 = shalt.err (!%p326_p2)
}
   0x9   :  { %s330_s18 = scalar_lea.vmem %s16_s10, 256  ;;  %p335_p4 = scmp.lt.s32.totalorder %s16_s10, %s16_s10 }
   0xa   :  { %p331_p3 = scmp.ne.s32.totalorder %s16_s10, %s330_s18  ;;  %p336_p5 = scmp.lt.s32.totalorder %s330_s18, %s330_s18 }
   0xc   :  { %p337_p6 = por %p336_p5, %p335_p4 }
   0xe   :  { %p338_p7 = pnand %p337_p6, %p331_p3 }
  0x10   :  { %341 = shalt.err (!%p338_p7)
}
  0x11   :  { %s393_s19 = smov 128   ;;  %s394_s20 = smov 8  }
  0x12   :  { %21 = dma.hbm_to_vmem [thread:$0]  %s457_s0, 256, %s16_s10, [#allocation3], %s393_s19, %s393_s19, %s394_s20  }
  0x13   :  { %s395_s23 = smov [#allocation5]   ;;  %s342_s27 = scalar_lea.hbm %s458_s1, 256 }
  0x14   :  { %s27_s24 = sshll.u32 %s395_s23, 4  ;;  %p343_p8 = scmp.ne.s32.totalorder %s458_s1, %s342_s27  ;;  %s28_s24 = int_to_ptr.vmem [resolvable:$true] %s27_s24 }
  0x15   :  { %p346_p9 = scmp.lt.u32.totalorder %s342_s27, %s458_s1 }
  0x17   :  { %p348_p10 = pnand %p346_p9, %p343_p8 }
  0x19   :  { %351 = shalt.err (!%p348_p10)
}
  0x1a   :  { %s352_s4 = scalar_lea.vmem %s28_s24, 256  ;;  %p357_p12 = scmp.lt.s32.totalorder %s28_s24, %s28_s24 }
  0x1b   :  { %p353_p11 = scmp.ne.s32.totalorder %s28_s24, %s352_s4  ;;  %p358_p13 = scmp.lt.s32.totalorder %s352_s4, %s352_s4 }
  0x1d   :  { %p359_p0 = por %p358_p13, %p357_p12 }
  0x1f   :  { %p360_p1 = pnand %p359_p0, %p353_p11 }
  0x21   :  { %363 = shalt.err (!%p360_p1)
}
  0x22   :  { %33 = dma.hbm_to_vmem [thread:$0]  %s458_s1, 256, %s28_s24, [#allocation6], %s393_s19, %s393_s19, %s394_s20  }
  0x23   :  { %386 = dma.done.wait [#allocation3], 256  }
  0x24   :  { %387 = vsyncadd [#allocation3], 4294967040 }
  0x25   :  { %388 = dma.done.wait [#allocation6], 256  }
  0x26   :  { %389 = vsyncadd [#allocation6], 4294967040  ;;  %v40_v0 = vld [vmem:[#allocation2] sm:$0xff]  ;;  %v42_v1 = vld [vmem:[#allocation5] sm:$0xff]  ;;  %vm76_vm0 = vcmask 64512   ;;  %vm271_vm1 = vcmask 261120  }
  0x27   :  { %44 = vxpose.xlu0.b32.start.end [1/1] (short) (narrow) %v40_v0, 16  ;;  %v41_v2 = vld [vmem:[#allocation2 + $0x8] sm:$0xff]  ;;  %304 = vmatprep.subr.mxu0 %v42_v1  ;;  %v43_v3 = vld [vmem:[#allocation5 + $0x8] sm:$0xff]  ;;  %s396_s1 = smov [#allocation7]  }
  0x28   :  { %305 = vmatpush3.msra.mxu0 %v42_v1  ;;  %309 = vmatprep.subr.mxu1 %v43_v3  ;;  %s281_s6 = sshll.u32 %s396_s1, 4  ;;  %s282_s6 = int_to_ptr.vmem [resolvable:$true] %s281_s6 }
  0x29   :  { %310 = vmatpush3.msra.mxu1 %v43_v3  ;;  %s364_s7 = scalar_lea.vmem %s282_s6, 512  ;;  %p369_p3 = scmp.lt.s32.totalorder %s282_s6, %s282_s6 }
  0x2a   :  { %p365_p2 = scmp.ne.s32.totalorder %s282_s6, %s364_s7  ;;  %p370_p4 = scmp.lt.s32.totalorder %s364_s7, %s364_s7 }
  0x2c   :  { %158 = vxpose.xlu0.b32.start.end [1/1] (short) (narrow) %v41_v2, 16  ;;  %p371_p5 = por %p370_p4, %p369_p3 }
  0x2e   :  { %p372_p6 = pnand %p371_p5, %p365_p2 }
  0xa7   :  { %v60_v4 = vpop.trf.xlu0 }
  0xa8   :  { %306 = vmatprep.mubr.msk.f32.mxu0 %vm76_vm0, %v60_v4 }
  0xab   :  { %v61_v5 = vpop.trf.xlu0 }
  0xac   :  { %307 = vmatmul.mubr.msk.f32.vlgmr.msra.gmra.mrb[0].mxu0 %vm76_vm0, %v61_v5 }
  0xaf   :  { %v174_v6 = vpop.trf.xlu0 }
  0xb0   :  { %311 = vmatprep.mubr.msk.f32.mxu1 %vm76_vm0, %v174_v6 }
  0xb3   :  { %v175_v7 = vpop.trf.xlu0 }
  0xb4   :  { %312 = vmatmul.mubr.msk.f32.vlgmr.msra.gmra.mrb[0].mxu1 %vm76_vm0, %v175_v7 }
 0x17f   :  { %v308_v8 = vpop.f32.mrb[0].mxu0 }
 0x180   :  { %273 = vst.msk [vmem:[#allocation7 + $0x8] sm:$0xff] %vm271_vm1, %v308_v8  ;;  %v149_v9 = vpop.f32.mrb[1].mxu0 }
 0x181   :  { %272 = vst.msk [vmem:[#allocation7] sm:$0xff] %vm271_vm1, %v149_v9 }
 0x187   :  { %v313_v10 = vpop.f32.mrb[0].mxu1 }
 0x188   :  { %275 = vst.msk [vmem:[#allocation7 + $0x18] sm:$0xff] %vm271_vm1, %v313_v10  ;;  %v262_v11 = vpop.f32.mrb[1].mxu1 }
 0x189   :  { %274 = vst.msk [vmem:[#allocation7 + $0x10] sm:$0xff] %vm271_vm1, %v262_v11 }
 0x18a   :  { %375 = shalt.err (!%p372_p6)
}
 0x18b   :  { %s376_s10 = scalar_lea.hbm %s459_s2, 512 }
 0x18c   :  { %p377_p7 = scmp.ne.s32.totalorder %s459_s2, %s376_s10  ;;  %p380_p8 = scmp.lt.u32.totalorder %s376_s10, %s459_s2 }
 0x18e   :  { %p382_p9 = pnand %p380_p8, %p377_p7 }
 0x190   :  { %385 = shalt.err (!%p382_p9)
}
 0x191   :  { %287 = dma.vmem_to_hbm [thread:$0]  %s282_s6, 512, %s459_s2, [#allocation4], %s393_s19, %s393_s19, %s394_s20  }
 0x192   :  { %390 = dma.done.wait [#allocation4], 512  }
 0x193   :  { %391 = vsyncadd [#allocation4], 4294966784 }
 0x194   :  { %291 = vsyncpa [#allocation3], 1 }
 0x195   :  { %292 = vsyncpa [#allocation6], 1 }
 0x196   :  { %293 = vsyncpa [#allocation4], 1 }

</bundles_post_ra>
